<compile_context>
chip_gen: v7x
topology: tpu7x:2x2x1
jax: 0.10.0
libtpu: 0.0.40
codegen_flags: <defaults>
</compile_context>

<pallas_src>
import jax
import jax.numpy as jnp
from jax.experimental import pallas as pl
from jax.experimental.pallas import tpu as pltpu

HIGH = jax.lax.Precision.HIGHEST  # reference only; the kernel uses default precision


# ----------------------------------------------------------------------------
# Pallas kernel
# ----------------------------------------------------------------------------
def cnn_lstm_kernel(patches_ref, wconv_ref, bconv_ref,
                    wih_ref, whh_ref, blstm_ref,
                    w1_ref, b1_ref, w2_ref, b2_ref,
                    out_ref):
    """Forward pass for one batch block, everything VMEM-resident.

    patches_ref: (T, Bb, K*Cin)   time-major im2col patches for this block
    wconv_ref  : (K*Cin, Cout)    packed Conv1d weight
    bconv_ref  : (1, Cout)
    wih_ref    : (Cout, 4H)       LSTM input weights (gate order i,f,g,o)
    whh_ref    : (H, 4H)          LSTM recurrent weights
    blstm_ref  : (1, 4H)          b_ih + b_hh
    w1_ref     : (H, F), b1_ref: (1, F)
    w2_ref     : (1, F)  (fc2 weight as a row), b2_ref: (1, 1)
    out_ref    : (1, Bb)          batch on the lane axis (lane-dense store)
    """
    T, Bb, KCin = patches_ref.shape
    H = whh_ref.shape[0]

    # ---- Conv1d + bias + ReLU as a single im2col matmul (1 MXU push).
    p = patches_ref[...].reshape(T * Bb, KCin)
    conv = jnp.maximum(
        jnp.dot(p, wconv_ref[...], preferred_element_type=jnp.float32)
        + bconv_ref[...], 0.0)                                    # (T*Bb, Cout)

    # ---- Hoist LSTM input projection out of the recurrence; fold in the bias.
    gates_x = (jnp.dot(conv, wih_ref[...], preferred_element_type=jnp.float32)
               + blstm_ref[...]).reshape(T, Bb, 4 * H)            # (T, Bb, 4H)

    # ---- LSTM recurrence, PyTorch gate order: i, f, g, o.
    # Only h @ whh remains on the serial critical path; gates_x[t] is a cheap
    # leading-axis static index (time-major layout).
    whh = whh_ref[...]
    h = jnp.zeros((Bb, H), jnp.float32)
    c = jnp.zeros((Bb, H), jnp.float32)
    for t in range(T):  # T is small & static -> keep the unroll
        # NOTE: for large T switch to lax.fori_loop(..., unroll=2..4) to bound
        # vreg live ranges; at T=8 the static unroll is fine.
        gates = gates_x[t] + jnp.dot(h, whh,
                                     preferred_element_type=jnp.float32)
        s = jax.nn.sigmoid(gates)                 # one EUP pass, all 4H lanes
        g = jnp.tanh(gates[:, 2 * H:3 * H])       # tanh only on the g-gate lanes
        c = s[:, 1 * H:2 * H] * c + s[:, 0 * H:1 * H] * g
        h = s[:, 3 * H:4 * H] * jnp.tanh(c)

    # ---- FC head on the last time step.
    z = jnp.maximum(jnp.dot(h, w1_ref[...], preferred_element_type=jnp.float32)
                    + b1_ref[...], 0.0)                            # (Bb, F)
    # fc2 is an N=1 matmul: VPU multiply + lane reduction instead of the MXU.
    y = jnp.sum(z * w2_ref[...], axis=-1, keepdims=True) + b2_ref[...]  # (Bb, 1)
    out_ref[...] = y.reshape(1, Bb)               # lane-dense (batch on lanes)


# ----------------------------------------------------------------------------
# Wrapper (plain-JAX glue: padding, im2col, BlockSpecs)
# ----------------------------------------------------------------------------
def _im2col(x, K):
    """(B, T, Cin) -> (B, T, K*Cin) 'same' padded patches (odd K)."""
    B, T, Cin = x.shape
    pad = K // 2
    xp = jnp.pad(x, ((0, 0), (pad, pad), (0, 0)))
    cols = [xp[:, k:k + T, :] for k in range(K)]
    return jnp.concatenate(cols, axis=-1)


def cnn_lstm_forward(x, params, *, num_cores=1, b_blk=None):
    """x: (B, T, input_dim) float32 -> (B, 1) float32.

    num_cores: set to 2 on v7x (2 TensorCores/chip) to allow a batch split;
    the split is only taken when each block still has >= 8 real batch rows.
    """
    B, T, Cin = x.shape
    KCin = params["wconv"].shape[0]
    K = KCin // Cin
    # PyTorch Conv1d(padding=K//2) only preserves length for odd K.
    assert K % 2 == 1, "kernel_size must be odd for 'same-length' Conv1d output"

    # Wrapper-side layout plumbing: im2col + transpose to time-major (T, B, KCin)
    # so the kernel's per-step access is a leading-axis index.
    patches = jnp.transpose(_im2col(x, K), (1, 0, 2))  # (T, B, K*Cin)

    if b_blk is None:
        # Only split the batch across grid points when a second TensorCore
        # exists (v7x) AND each block keeps >= 8 real rows; on single-TC
        # v5e/v6e a split is pure serialization of the whole forward pass.
        if num_cores > 1 and B % num_cores == 0 and (B // num_cores) >= 8:
            b_blk = B // num_cores
        else:
            b_blk = B
    assert B % b_blk == 0
    n_blk = B // b_blk

    def full_spec(a):
        # Full-array block, constant block index -> stays VMEM-resident
        # across grid iterations (no re-DMA of weights per batch block).
        # With the default n_blk == 1 these are effectively single-buffered.
        return pl.BlockSpec(a.shape, lambda i, _nd=a.ndim: (0,) * _nd)

    args = (patches, params["wconv"], params["bconv"],
            params["wih"], params["whh"], params["blstm"],
            params["w1"], params["b1"], params["w2"], params["b2"])

    in_specs = ([pl.BlockSpec((T, b_blk, KCin), lambda i: (0, i, 0))]
                + [full_spec(a) for a in args[1:]])

    out = pl.pallas_call(
        cnn_lstm_kernel,
        out_shape=jax.ShapeDtypeStruct((n_blk, b_blk), jnp.float32),
        grid=(n_blk,),
        in_specs=in_specs,
        out_specs=pl.BlockSpec((1, b_blk), lambda i: (i, 0)),
        compiler_params=pltpu.CompilerParams(
            dimension_semantics=("parallel",),      # only matters when n_blk > 1
            vmem_limit_bytes=32 * 1024 * 1024),     # safe on v5e/v6e/v7x at these sizes
    )(*args)
    return out.reshape(B, 1)


# ----------------------------------------------------------------------------
# Parameter init (PyTorch-style uniform, pre-transposed / pre-packed)
# ----------------------------------------------------------------------------
def init_params(key, input_dim, cnn_out_channels, kernel_size, hidden_dim, fc_dim):
    ks = jax.random.split(key, 10)

    def unif(k, shape, fan_in):
        bound = 1.0 / jnp.sqrt(jnp.float32(fan_in))
        return jax.random.uniform(k, shape, jnp.float32, -bound, bound)

    K, Cin, Cout, H, F = kernel_size, input_dim, cnn_out_channels, hidden_dim, fc_dim
    # Conv1d: torch weight (Cout, Cin, K) -> per-tap (K, Cin, Cout) -> packed (K*Cin, Cout)
    wconv = jnp.transpose(unif(ks[0], (Cout, Cin, K), Cin * K), (2, 1, 0)).reshape(K * Cin, Cout)
    bconv = unif(ks[1], (1, Cout), Cin * K)
    # LSTM: torch weight_ih (4H, Cout) -> (Cout, 4H); weight_hh (4H, H) -> (H, 4H)
    wih = unif(ks[2], (4 * H, Cout), H).T
    whh = unif(ks[3], (4 * H, H), H).T
    blstm = unif(ks[4], (1, 4 * H), H) + unif(ks[5], (1, 4 * H), H)   # b_ih + b_hh
    # fc1: (F, H) -> (H, F); fc2 weight kept as a row (1, F) for the VPU reduce
    w1 = unif(ks[6], (F, H), H).T
    b1 = unif(ks[7], (1, F), H)
    w2 = unif(ks[8], (1, F), F)
    b2 = unif(ks[9], (1, 1), F)
    return dict(wconv=wconv, bconv=bconv, wih=wih, whh=whh, blstm=blstm,
                w1=w1, b1=b1, w2=w2, b2=b2)


# ----------------------------------------------------------------------------
# Pure-JAX f32 reference (HIGHEST precision) for correctness check
# ----------------------------------------------------------------------------
def reference_forward(x, params):
    B, T, Cin = x.shape
    KCin = params["wconv"].shape[0]
    K = KCin // Cin
    H = params["whh"].shape[0]

    patches = _im2col(x, K).reshape(B * T, KCin)
    conv = jnp.maximum(
        jnp.dot(patches, params["wconv"], precision=HIGH,
                preferred_element_type=jnp.float32) + params["bconv"], 0.0)
    gates_x = (jnp.dot(conv, params["wih"], precision=HIGH,
                       preferred_element_type=jnp.float32)
               + params["blstm"]).reshape(B, T, 4 * H)

    h = jnp.zeros((B, H), jnp.float32)
    c = jnp.zeros((B, H), jnp.float32)
    for t in range(T):
        gates = gates_x[:, t, :] + jnp.dot(h, params["whh"], precision=HIGH,
                                           preferred_element_type=jnp.float32)
        i_g = jax.nn.sigmoid(gates[:, 0 * H:1 * H])
        f_g = jax.nn.sigmoid(gates[:, 1 * H:2 * H])
        g_g = jnp.tanh(gates[:, 2 * H:3 * H])
        o_g = jax.nn.sigmoid(gates[:, 3 * H:4 * H])
        c = f_g * c + i_g * g_g
        h = o_g * jnp.tanh(c)

    z = jnp.maximum(jnp.dot(h, params["w1"], precision=HIGH,
                            preferred_element_type=jnp.float32) + params["b1"], 0.0)
    return jnp.dot(z, params["w2"].T, precision=HIGH,
                   preferred_element_type=jnp.float32) + params["b2"]


if __name__ == "__main__":
    # Small shapes consistent with the module's forward:
    B, T = 2, 8                 # batch, sequence length
    INPUT_DIM = 4               # features per time step
    CNN_OUT, KSIZE = 32, 5
    HIDDEN, FC = 32, 16

    key = jax.random.PRNGKey(0)
    k_x, k_p = jax.random.split(key)
    x = jax.random.normal(k_x, (B, T, INPUT_DIM), jnp.float32)
    params = init_params(k_p, INPUT_DIM, CNN_OUT, KSIZE, HIDDEN, FC)

    out = jax.block_until_ready(cnn_lstm_forward(x, params))
    ref = jax.block_until_ready(reference_forward(x, params))

    assert out.shape == (B, 1)
    # Kernel uses default (bf16-pass) MXU precision; compare against the f32
    # reference with a tolerance that accounts for that.
    assert jnp.allclose(out, ref, rtol=2e-2, atol=2e-2), (out, ref)

    print("KERNEL_OK")
</pallas_src>

<mosaic_0001>
module attributes {stable_mosaic.version = 11 : i64} {
  func.func @cnn_lstm_kernel(%arg0: i32, %arg1: memref<8x2x20xf32, #tpu.memory_space<vmem>>, %arg2: memref<20x32xf32, #tpu.memory_space<vmem>>, %arg3: memref<1x32xf32, #tpu.memory_space<vmem>>, %arg4: memref<32x128xf32, #tpu.memory_space<vmem>>, %arg5: memref<32x128xf32, #tpu.memory_space<vmem>>, %arg6: memref<1x128xf32, #tpu.memory_space<vmem>>, %arg7: memref<32x16xf32, #tpu.memory_space<vmem>>, %arg8: memref<1x16xf32, #tpu.memory_space<vmem>>, %arg9: memref<1x16xf32, #tpu.memory_space<vmem>>, %arg10: memref<1x1xf32, #tpu.memory_space<vmem>>, %arg11: memref<1x2xf32, #tpu.memory_space<vmem>>) attributes {dimension_semantics = [#tpu.dimension_semantics<parallel>], iteration_bounds = array<i64: 1>, scalar_prefetch = 0 : i64, scratch_operands = 0 : i64, tpu.core_type = #tpu.core_type<tc>, window_params = [{transform_indices = @transform_0, window_bounds = array<i64: 8, 2, 20>}, {pipeline_mode = #tpu.pipeline_mode<synchronous>, transform_indices = @transform_1, window_bounds = array<i64: 20, 32>}, {pipeline_mode = #tpu.pipeline_mode<synchronous>, transform_indices = @transform_2, window_bounds = array<i64: 1, 32>}, {pipeline_mode = #tpu.pipeline_mode<synchronous>, transform_indices = @transform_3, window_bounds = array<i64: 32, 128>}, {pipeline_mode = #tpu.pipeline_mode<synchronous>, transform_indices = @transform_4, window_bounds = array<i64: 32, 128>}, {pipeline_mode = #tpu.pipeline_mode<synchronous>, transform_indices = @transform_5, window_bounds = array<i64: 1, 128>}, {pipeline_mode = #tpu.pipeline_mode<synchronous>, transform_indices = @transform_6, window_bounds = array<i64: 32, 16>}, {pipeline_mode = #tpu.pipeline_mode<synchronous>, transform_indices = @transform_7, window_bounds = array<i64: 1, 16>}, {pipeline_mode = #tpu.pipeline_mode<synchronous>, transform_indices = @transform_8, window_bounds = array<i64: 1, 16>}, {pipeline_mode = #tpu.pipeline_mode<synchronous>, transform_indices = @transform_9, window_bounds = array<i64: 1, 1>}, {transform_indices = @transform_10, window_bounds = array<i64: 1, 2>}]} {
    %c0 = arith.constant 0 : index
    %c0_0 = arith.constant 0 : index
    %c0_1 = arith.constant 0 : index
    %0 = vector.load %arg1[%c0, %c0_0, %c0_1] : memref<8x2x20xf32, #tpu.memory_space<vmem>>, vector<8x2x20xf32>
    %1 = vector.shape_cast %0 : vector<8x2x20xf32> to vector<16x20xf32>
    %c0_2 = arith.constant 0 : index
    %c0_3 = arith.constant 0 : index
    %2 = vector.load %arg2[%c0_2, %c0_3] : memref<20x32xf32, #tpu.memory_space<vmem>>, vector<20x32xf32>
    %cst = arith.constant dense<0.000000e+00> : vector<16x32xf32>
    %3 = tpu.matmul %1, %2, %cst {dimension_numbers = #tpu.dot_dimension_numbers<[1], [0], [0], [1], [0, 0, 1, 1], [], []>} : vector<16x20xf32>, vector<20x32xf32>, vector<16x32xf32> -> vector<16x32xf32>
    %c0_4 = arith.constant 0 : index
    %c0_5 = arith.constant 0 : index
    %4 = vector.load %arg3[%c0_4, %c0_5] : memref<1x32xf32, #tpu.memory_space<vmem>>, vector<1x32xf32>
    %5 = vector.broadcast %4 : vector<1x32xf32> to vector<16x32xf32>
    %6 = arith.addf %3, %5 : vector<16x32xf32>
    %cst_6 = arith.constant 0.000000e+00 : f32
    %7 = vector.broadcast %cst_6 : f32 to vector<16x32xf32>
    %8 = arith.maximumf %6, %7 : vector<16x32xf32>
    %c0_7 = arith.constant 0 : index
    %c0_8 = arith.constant 0 : index
    %9 = vector.load %arg4[%c0_7, %c0_8] : memref<32x128xf32, #tpu.memory_space<vmem>>, vector<32x128xf32>
    %cst_9 = arith.constant dense<0.000000e+00> : vector<16x128xf32>
    %10 = tpu.matmul %8, %9, %cst_9 {dimension_numbers = #tpu.dot_dimension_numbers<[1], [0], [0], [1], [0, 0, 1, 1], [], []>} : vector<16x32xf32>, vector<32x128xf32>, vector<16x128xf32> -> vector<16x128xf32>
    %c0_10 = arith.constant 0 : index
    %c0_11 = arith.constant 0 : index
    %11 = vector.load %arg6[%c0_10, %c0_11] : memref<1x128xf32, #tpu.memory_space<vmem>>, vector<1x128xf32>
    %12 = vector.broadcast %11 : vector<1x128xf32> to vector<16x128xf32>
    %13 = arith.addf %10, %12 : vector<16x128xf32>
    %14 = vector.shape_cast %13 : vector<16x128xf32> to vector<8x2x128xf32>
    %c0_12 = arith.constant 0 : index
    %c0_13 = arith.constant 0 : index
    %15 = vector.load %arg5[%c0_12, %c0_13] : memref<32x128xf32, #tpu.memory_space<vmem>>, vector<32x128xf32>
    %cst_14 = arith.constant 0.000000e+00 : f32
    %16 = vector.broadcast %cst_14 : f32 to vector<2x32xf32>
    %cst_15 = arith.constant 0.000000e+00 : f32
    %17 = vector.broadcast %cst_15 : f32 to vector<2x32xf32>
    %18 = vector.extract_strided_slice %14 {offsets = [0, 0, 0], sizes = [1, 2, 128], strides = [1, 1, 1]} : vector<8x2x128xf32> to vector<1x2x128xf32>
    %19 = vector.shape_cast %18 : vector<1x2x128xf32> to vector<2x128xf32>
    %cst_16 = arith.constant dense<0.000000e+00> : vector<2x128xf32>
    %20 = tpu.matmul %16, %15, %cst_16 {dimension_numbers = #tpu.dot_dimension_numbers<[1], [0], [0], [1], [0, 0, 1, 1], [], []>} : vector<2x32xf32>, vector<32x128xf32>, vector<2x128xf32> -> vector<2x128xf32>
    %21 = arith.addf %19, %20 : vector<2x128xf32>
    %22 = arith.negf %21 : vector<2x128xf32>
    %23 = math.exp %22 : vector<2x128xf32>
    %cst_17 = arith.constant 1.000000e+00 : f32
    %24 = vector.broadcast %cst_17 : f32 to vector<2x128xf32>
    %25 = arith.addf %24, %23 : vector<2x128xf32>
    %26 = arith.divf %24, %25 : vector<2x128xf32>
    %27 = vector.extract_strided_slice %21 {offsets = [0, 64], sizes = [2, 32], strides = [1, 1]} : vector<2x128xf32> to vector<2x32xf32>
    %28 = math.tanh %27 : vector<2x32xf32>
    %29 = vector.extract_strided_slice %26 {offsets = [0, 32], sizes = [2, 32], strides = [1, 1]} : vector<2x128xf32> to vector<2x32xf32>
    %30 = arith.mulf %29, %17 : vector<2x32xf32>
    %31 = vector.extract_strided_slice %26 {offsets = [0, 0], sizes = [2, 32], strides = [1, 1]} : vector<2x128xf32> to vector<2x32xf32>
    %32 = arith.mulf %31, %28 : vector<2x32xf32>
    %33 = arith.addf %30, %32 : vector<2x32xf32>
    %34 = vector.extract_strided_slice %26 {offsets = [0, 96], sizes = [2, 32], strides = [1, 1]} : vector<2x128xf32> to vector<2x32xf32>
    %35 = math.tanh %33 : vector<2x32xf32>
    %36 = arith.mulf %34, %35 : vector<2x32xf32>
    %37 = vector.extract_strided_slice %14 {offsets = [1, 0, 0], sizes = [1, 2, 128], strides = [1, 1, 1]} : vector<8x2x128xf32> to vector<1x2x128xf32>
    %38 = vector.shape_cast %37 : vector<1x2x128xf32> to vector<2x128xf32>
    %cst_18 = arith.constant dense<0.000000e+00> : vector<2x128xf32>
    %39 = tpu.matmul %36, %15, %cst_18 {dimension_numbers = #tpu.dot_dimension_numbers<[1], [0], [0], [1], [0, 0, 1, 1], [], []>} : vector<2x32xf32>, vector<32x128xf32>, vector<2x128xf32> -> vector<2x128xf32>
    %40 = arith.addf %38, %39 : vector<2x128xf32>
    %41 = arith.negf %40 : vector<2x128xf32>
    %42 = math.exp %41 : vector<2x128xf32>
    %cst_19 = arith.constant 1.000000e+00 : f32
    %43 = vector.broadcast %cst_19 : f32 to vector<2x128xf32>
    %44 = arith.addf %43, %42 : vector<2x128xf32>
    %45 = arith.divf %43, %44 : vector<2x128xf32>
    %46 = vector.extract_strided_slice %40 {offsets = [0, 64], sizes = [2, 32], strides = [1, 1]} : vector<2x128xf32> to vector<2x32xf32>
    %47 = math.tanh %46 : vector<2x32xf32>
    %48 = vector.extract_strided_slice %45 {offsets = [0, 32], sizes = [2, 32], strides = [1, 1]} : vector<2x128xf32> to vector<2x32xf32>
    %49 = arith.mulf %48, %33 : vector<2x32xf32>
    %50 = vector.extract_strided_slice %45 {offsets = [0, 0], sizes = [2, 32], strides = [1, 1]} : vector<2x128xf32> to vector<2x32xf32>
    %51 = arith.mulf %50, %47 : vector<2x32xf32>
    %52 = arith.addf %49, %51 : vector<2x32xf32>
    %53 = vector.extract_strided_slice %45 {offsets = [0, 96], sizes = [2, 32], strides = [1, 1]} : vector<2x128xf32> to vector<2x32xf32>
    %54 = math.tanh %52 : vector<2x32xf32>
    %55 = arith.mulf %53, %54 : vector<2x32xf32>
    %56 = vector.extract_strided_slice %14 {offsets = [2, 0, 0], sizes = [1, 2, 128], strides = [1, 1, 1]} : vector<8x2x128xf32> to vector<1x2x128xf32>
    %57 = vector.shape_cast %56 : vector<1x2x128xf32> to vector<2x128xf32>
    %cst_20 = arith.constant dense<0.000000e+00> : vector<2x128xf32>
    %58 = tpu.matmul %55, %15, %cst_20 {dimension_numbers = #tpu.dot_dimension_numbers<[1], [0], [0], [1], [0, 0, 1, 1], [], []>} : vector<2x32xf32>, vector<32x128xf32>, vector<2x128xf32> -> vector<2x128xf32>
    %59 = arith.addf %57, %58 : vector<2x128xf32>
    %60 = arith.negf %59 : vector<2x128xf32>
    %61 = math.exp %60 : vector<2x128xf32>
    %cst_21 = arith.constant 1.000000e+00 : f32
    %62 = vector.broadcast %cst_21 : f32 to vector<2x128xf32>
    %63 = arith.addf %62, %61 : vector<2x128xf32>
    %64 = arith.divf %62, %63 : vector<2x128xf32>
    %65 = vector.extract_strided_slice %59 {offsets = [0, 64], sizes = [2, 32], strides = [1, 1]} : vector<2x128xf32> to vector<2x32xf32>
    %66 = math.tanh %65 : vector<2x32xf32>
    %67 = vector.extract_strided_slice %64 {offsets = [0, 32], sizes = [2, 32], strides = [1, 1]} : vector<2x128xf32> to vector<2x32xf32>
    %68 = arith.mulf %67, %52 : vector<2x32xf32>
    %69 = vector.extract_strided_slice %64 {offsets = [0, 0], sizes = [2, 32], strides = [1, 1]} : vector<2x128xf32> to vector<2x32xf32>
    %70 = arith.mulf %69, %66 : vector<2x32xf32>
    %71 = arith.addf %68, %70 : vector<2x32xf32>
    %72 = vector.extract_strided_slice %64 {offsets = [0, 96], sizes = [2, 32], strides = [1, 1]} : vector<2x128xf32> to vector<2x32xf32>
    %73 = math.tanh %71 : vector<2x32xf32>
    %74 = arith.mulf %72, %73 : vector<2x32xf32>
    %75 = vector.extract_strided_slice %14 {offsets = [3, 0, 0], sizes = [1, 2, 128], strides = [1, 1, 1]} : vector<8x2x128xf32> to vector<1x2x128xf32>
    %76 = vector.shape_cast %75 : vector<1x2x128xf32> to vector<2x128xf32>
    %cst_22 = arith.constant dense<0.000000e+00> : vector<2x128xf32>
    %77 = tpu.matmul %74, %15, %cst_22 {dimension_numbers = #tpu.dot_dimension_numbers<[1], [0], [0], [1], [0, 0, 1, 1], [], []>} : vector<2x32xf32>, vector<32x128xf32>, vector<2x128xf32> -> vector<2x128xf32>
    %78 = arith.addf %76, %77 : vector<2x128xf32>
    %79 = arith.negf %78 : vector<2x128xf32>
    %80 = math.exp %79 : vector<2x128xf32>
    %cst_23 = arith.constant 1.000000e+00 : f32
    %81 = vector.broadcast %cst_23 : f32 to vector<2x128xf32>
    %82 = arith.addf %81, %80 : vector<2x128xf32>
    %83 = arith.divf %81, %82 : vector<2x128xf32>
    %84 = vector.extract_strided_slice %78 {offsets = [0, 64], sizes = [2, 32], strides = [1, 1]} : vector<2x128xf32> to vector<2x32xf32>
    %85 = math.tanh %84 : vector<2x32xf32>
    %86 = vector.extract_strided_slice %83 {offsets = [0, 32], sizes = [2, 32], strides = [1, 1]} : vector<2x128xf32> to vector<2x32xf32>
    %87 = arith.mulf %86, %71 : vector<2x32xf32>
    %88 = vector.extract_strided_slice %83 {offsets = [0, 0], sizes = [2, 32], strides = [1, 1]} : vector<2x128xf32> to vector<2x32xf32>
    %89 = arith.mulf %88, %85 : vector<2x32xf32>
    %90 = arith.addf %87, %89 : vector<2x32xf32>
    %91 = vector.extract_strided_slice %83 {offsets = [0, 96], sizes = [2, 32], strides = [1, 1]} : vector<2x128xf32> to vector<2x32xf32>
    %92 = math.tanh %90 : vector<2x32xf32>
    %93 = arith.mulf %91, %92 : vector<2x32xf32>
    %94 = vector.extract_strided_slice %14 {offsets = [4, 0, 0], sizes = [1, 2, 128], strides = [1, 1, 1]} : vector<8x2x128xf32> to vector<1x2x128xf32>
    %95 = vector.shape_cast %94 : vector<1x2x128xf32> to vector<2x128xf32>
    %cst_24 = arith.constant dense<0.000000e+00> : vector<2x128xf32>
    %96 = tpu.matmul %93, %15, %cst_24 {dimension_numbers = #tpu.dot_dimension_numbers<[1], [0], [0], [1], [0, 0, 1, 1], [], []>} : vector<2x32xf32>, vector<32x128xf32>, vector<2x128xf32> -> vector<2x128xf32>
    %97 = arith.addf %95, %96 : vector<2x128xf32>
    %98 = arith.negf %97 : vector<2x128xf32>
    %99 = math.exp %98 : vector<2x128xf32>
    %cst_25 = arith.constant 1.000000e+00 : f32
    %100 = vector.broadcast %cst_25 : f32 to vector<2x128xf32>
    %101 = arith.addf %100, %99 : vector<2x128xf32>
    %102 = arith.divf %100, %101 : vector<2x128xf32>
    %103 = vector.extract_strided_slice %97 {offsets = [0, 64], sizes = [2, 32], strides = [1, 1]} : vector<2x128xf32> to vector<2x32xf32>
    %104 = math.tanh %103 : vector<2x32xf32>
    %105 = vector.extract_strided_slice %102 {offsets = [0, 32], sizes = [2, 32], strides = [1, 1]} : vector<2x128xf32> to vector<2x32xf32>
    %106 = arith.mulf %105, %90 : vector<2x32xf32>
    %107 = vector.extract_strided_slice %102 {offsets = [0, 0], sizes = [2, 32], strides = [1, 1]} : vector<2x128xf32> to vector<2x32xf32>
    %108 = arith.mulf %107, %104 : vector<2x32xf32>
    %109 = arith.addf %106, %108 : vector<2x32xf32>
    %110 = vector.extract_strided_slice %102 {offsets = [0, 96], sizes = [2, 32], strides = [1, 1]} : vector<2x128xf32> to vector<2x32xf32>
    %111 = math.tanh %109 : vector<2x32xf32>
    %112 = arith.mulf %110, %111 : vector<2x32xf32>
    %113 = vector.extract_strided_slice %14 {offsets = [5, 0, 0], sizes = [1, 2, 128], strides = [1, 1, 1]} : vector<8x2x128xf32> to vector<1x2x128xf32>
    %114 = vector.shape_cast %113 : vector<1x2x128xf32> to vector<2x128xf32>
    %cst_26 = arith.constant dense<0.000000e+00> : vector<2x128xf32>
    %115 = tpu.matmul %112, %15, %cst_26 {dimension_numbers = #tpu.dot_dimension_numbers<[1], [0], [0], [1], [0, 0, 1, 1], [], []>} : vector<2x32xf32>, vector<32x128xf32>, vector<2x128xf32> -> vector<2x128xf32>
    %116 = arith.addf %114, %115 : vector<2x128xf32>
    %117 = arith.negf %116 : vector<2x128xf32>
    %118 = math.exp %117 : vector<2x128xf32>
    %cst_27 = arith.constant 1.000000e+00 : f32
    %119 = vector.broadcast %cst_27 : f32 to vector<2x128xf32>
    %120 = arith.addf %119, %118 : vector<2x128xf32>
    %121 = arith.divf %119, %120 : vector<2x128xf32>
    %122 = vector.extract_strided_slice %116 {offsets = [0, 64], sizes = [2, 32], strides = [1, 1]} : vector<2x128xf32> to vector<2x32xf32>
    %123 = math.tanh %122 : vector<2x32xf32>
    %124 = vector.extract_strided_slice %121 {offsets = [0, 32], sizes = [2, 32], strides = [1, 1]} : vector<2x128xf32> to vector<2x32xf32>
    %125 = arith.mulf %124, %109 : vector<2x32xf32>
    %126 = vector.extract_strided_slice %121 {offsets = [0, 0], sizes = [2, 32], strides = [1, 1]} : vector<2x128xf32> to vector<2x32xf32>
    %127 = arith.mulf %126, %123 : vector<2x32xf32>
    %128 = arith.addf %125, %127 : vector<2x32xf32>
    %129 = vector.extract_strided_slice %121 {offsets = [0, 96], sizes = [2, 32], strides = [1, 1]} : vector<2x128xf32> to vector<2x32xf32>
    %130 = math.tanh %128 : vector<2x32xf32>
    %131 = arith.mulf %129, %130 : vector<2x32xf32>
    %132 = vector.extract_strided_slice %14 {offsets = [6, 0, 0], sizes = [1, 2, 128], strides = [1, 1, 1]} : vector<8x2x128xf32> to vector<1x2x128xf32>
    %133 = vector.shape_cast %132 : vector<1x2x128xf32> to vector<2x128xf32>
    %cst_28 = arith.constant dense<0.000000e+00> : vector<2x128xf32>
    %134 = tpu.matmul %131, %15, %cst_28 {dimension_numbers = #tpu.dot_dimension_numbers<[1], [0], [0], [1], [0, 0, 1, 1], [], []>} : vector<2x32xf32>, vector<32x128xf32>, vector<2x128xf32> -> vector<2x128xf32>
    %135 = arith.addf %133, %134 : vector<2x128xf32>
    %136 = arith.negf %135 : vector<2x128xf32>
    %137 = math.exp %136 : vector<2x128xf32>
    %cst_29 = arith.constant 1.000000e+00 : f32
    %138 = vector.broadcast %cst_29 : f32 to vector<2x128xf32>
    %139 = arith.addf %138, %137 : vector<2x128xf32>
    %140 = arith.divf %138, %139 : vector<2x128xf32>
    %141 = vector.extract_strided_slice %135 {offsets = [0, 64], sizes = [2, 32], strides = [1, 1]} : vector<2x128xf32> to vector<2x32xf32>
    %142 = math.tanh %141 : vector<2x32xf32>
    %143 = vector.extract_strided_slice %140 {offsets = [0, 32], sizes = [2, 32], strides = [1, 1]} : vector<2x128xf32> to vector<2x32xf32>
    %144 = arith.mulf %143, %128 : vector<2x32xf32>
    %145 = vector.extract_strided_slice %140 {offsets = [0, 0], sizes = [2, 32], strides = [1, 1]} : vector<2x128xf32> to vector<2x32xf32>
    %146 = arith.mulf %145, %142 : vector<2x32xf32>
    %147 = arith.addf %144, %146 : vector<2x32xf32>
    %148 = vector.extract_strided_slice %140 {offsets = [0, 96], sizes = [2, 32], strides = [1, 1]} : vector<2x128xf32> to vector<2x32xf32>
    %149 = math.tanh %147 : vector<2x32xf32>
    %150 = arith.mulf %148, %149 : vector<2x32xf32>
    %151 = vector.extract_strided_slice %14 {offsets = [7, 0, 0], sizes = [1, 2, 128], strides = [1, 1, 1]} : vector<8x2x128xf32> to vector<1x2x128xf32>
    %152 = vector.shape_cast %151 : vector<1x2x128xf32> to vector<2x128xf32>
    %cst_30 = arith.constant dense<0.000000e+00> : vector<2x128xf32>
    %153 = tpu.matmul %150, %15, %cst_30 {dimension_numbers = #tpu.dot_dimension_numbers<[1], [0], [0], [1], [0, 0, 1, 1], [], []>} : vector<2x32xf32>, vector<32x128xf32>, vector<2x128xf32> -> vector<2x128xf32>
    %154 = arith.addf %152, %153 : vector<2x128xf32>
    %155 = arith.negf %154 : vector<2x128xf32>
    %156 = math.exp %155 : vector<2x128xf32>
    %cst_31 = arith.constant 1.000000e+00 : f32
    %157 = vector.broadcast %cst_31 : f32 to vector<2x128xf32>
    %158 = arith.addf %157, %156 : vector<2x128xf32>
    %159 = arith.divf %157, %158 : vector<2x128xf32>
    %160 = vector.extract_strided_slice %154 {offsets = [0, 64], sizes = [2, 32], strides = [1, 1]} : vector<2x128xf32> to vector<2x32xf32>
    %161 = math.tanh %160 : vector<2x32xf32>
    %162 = vector.extract_strided_slice %159 {offsets = [0, 32], sizes = [2, 32], strides = [1, 1]} : vector<2x128xf32> to vector<2x32xf32>
    %163 = arith.mulf %162, %147 : vector<2x32xf32>
    %164 = vector.extract_strided_slice %159 {offsets = [0, 0], sizes = [2, 32], strides = [1, 1]} : vector<2x128xf32> to vector<2x32xf32>
    %165 = arith.mulf %164, %161 : vector<2x32xf32>
    %166 = arith.addf %163, %165 : vector<2x32xf32>
    %167 = vector.extract_strided_slice %159 {offsets = [0, 96], sizes = [2, 32], strides = [1, 1]} : vector<2x128xf32> to vector<2x32xf32>
    %168 = math.tanh %166 : vector<2x32xf32>
    %169 = arith.mulf %167, %168 : vector<2x32xf32>
    %c0_32 = arith.constant 0 : index
    %c0_33 = arith.constant 0 : index
    %170 = vector.load %arg7[%c0_32, %c0_33] : memref<32x16xf32, #tpu.memory_space<vmem>>, vector<32x16xf32>
    %cst_34 = arith.constant dense<0.000000e+00> : vector<2x16xf32>
    %171 = tpu.matmul %169, %170, %cst_34 {dimension_numbers = #tpu.dot_dimension_numbers<[1], [0], [0], [1], [0, 0, 1, 1], [], []>} : vector<2x32xf32>, vector<32x16xf32>, vector<2x16xf32> -> vector<2x16xf32>
    %c0_35 = arith.constant 0 : index
    %c0_36 = arith.constant 0 : index
    %172 = vector.load %arg8[%c0_35, %c0_36] : memref<1x16xf32, #tpu.memory_space<vmem>>, vector<1x16xf32>
    %173 = vector.broadcast %172 : vector<1x16xf32> to vector<2x16xf32>
    %174 = arith.addf %171, %173 : vector<2x16xf32>
    %cst_37 = arith.constant 0.000000e+00 : f32
    %175 = vector.broadcast %cst_37 : f32 to vector<2x16xf32>
    %176 = arith.maximumf %174, %175 : vector<2x16xf32>
    %c0_38 = arith.constant 0 : index
    %c0_39 = arith.constant 0 : index
    %177 = vector.load %arg9[%c0_38, %c0_39] : memref<1x16xf32, #tpu.memory_space<vmem>>, vector<1x16xf32>
    %178 = vector.broadcast %177 : vector<1x16xf32> to vector<2x16xf32>
    %179 = arith.mulf %176, %178 : vector<2x16xf32>
    %cst_40 = arith.constant dense<0.000000e+00> : vector<2xf32>
    %180 = vector.multi_reduction <add>, %179, %cst_40 [1] : vector<2x16xf32> to vector<2xf32>
    %181 = vector.shape_cast %180 : vector<2xf32> to vector<2x1xf32>
    %c0_41 = arith.constant 0 : index
    %c0_42 = arith.constant 0 : index
    %182 = vector.load %arg10[%c0_41, %c0_42] : memref<1x1xf32, #tpu.memory_space<vmem>>, vector<1x1xf32>
    %183 = vector.broadcast %182 : vector<1x1xf32> to vector<2x1xf32>
    %184 = arith.addf %181, %183 : vector<2x1xf32>
    %185 = vector.shape_cast %184 : vector<2x1xf32> to vector<1x2xf32>
    %c0_43 = arith.constant 0 : index
    %c0_44 = arith.constant 0 : index
    %186 = vector.load %arg11[%c0_43, %c0_44] : memref<1x2xf32, #tpu.memory_space<vmem>>, vector<1x2xf32>
    tpu.vector_store %arg11[%c0_43, %c0_44], %185 {strides = array<i32>} : memref<1x2xf32, #tpu.memory_space<vmem>>, vector<1x2xf32>,
    return
  }
  func.func @transform_0(%arg0: i32) -> (i32, i32, i32) {
    %c0_i32 = arith.constant 0 : i32
    %c0_i32_0 = arith.constant 0 : i32
    %c0_i32_1 = arith.constant 0 : i32
    return %c0_i32, %arg0, %c0_i32_0 : i32, i32, i32
  }
  func.func @transform_1(%arg0: i32) -> (i32, i32) {
    %c0_i32 = arith.constant 0 : i32
    %c0_i32_0 = arith.constant 0 : i32
    %c0_i32_1 = arith.constant 0 : i32
    return %c0_i32, %c0_i32_0 : i32, i32
  }
  func.func @transform_2(%arg0: i32) -> (i32, i32) {
    %c0_i32 = arith.constant 0 : i32
    %c0_i32_0 = arith.constant 0 : i32
    %c0_i32_1 = arith.constant 0 : i32
    return %c0_i32, %c0_i32_0 : i32, i32
  }
  func.func @transform_3(%arg0: i32) -> (i32, i32) {
    %c0_i32 = arith.constant 0 : i32
    %c0_i32_0 = arith.constant 0 : i32
    %c0_i32_1 = arith.constant 0 : i32
    return %c0_i32, %c0_i32_0 : i32, i32
  }
  func.func @transform_4(%arg0: i32) -> (i32, i32) {
    %c0_i32 = arith.constant 0 : i32
    %c0_i32_0 = arith.constant 0 : i32
    %c0_i32_1 = arith.constant 0 : i32
    return %c0_i32, %c0_i32_0 : i32, i32
  }
  func.func @transform_5(%arg0: i32) -> (i32, i32) {
    %c0_i32 = arith.constant 0 : i32
    %c0_i32_0 = arith.constant 0 : i32
    %c0_i32_1 = arith.constant 0 : i32
    return %c0_i32, %c0_i32_0 : i32, i32
  }
  func.func @transform_6(%arg0: i32) -> (i32, i32) {
    %c0_i32 = arith.constant 0 : i32
    %c0_i32_0 = arith.constant 0 : i32
    %c0_i32_1 = arith.constant 0 : i32
    return %c0_i32, %c0_i32_0 : i32, i32
  }
  func.func @transform_7(%arg0: i32) -> (i32, i32) {
    %c0_i32 = arith.constant 0 : i32
    %c0_i32_0 = arith.constant 0 : i32
    %c0_i32_1 = arith.constant 0 : i32
    return %c0_i32, %c0_i32_0 : i32, i32
  }
  func.func @transform_8(%arg0: i32) -> (i32, i32) {
    %c0_i32 = arith.constant 0 : i32
    %c0_i32_0 = arith.constant 0 : i32
    %c0_i32_1 = arith.constant 0 : i32
    return %c0_i32, %c0_i32_0 : i32, i32
  }
  func.func @transform_9(%arg0: i32) -> (i32, i32) {
    %c0_i32 = arith.constant 0 : i32
    %c0_i32_0 = arith.constant 0 : i32
    %c0_i32_1 = arith.constant 0 : i32
    return %c0_i32, %c0_i32_0 : i32, i32
  }
  func.func @transform_10(%arg0: i32) -> (i32, i32) {
    %c0_i32 = arith.constant 0 : i32
    %c0_i32_0 = arith.constant 0 : i32
    return %arg0, %c0_i32 : i32, i32
  }
}

</mosaic_0001>

<bundles_post_ra>
// kernel: tpu_custom_call.1
= control target key start
LH: loop header
LB: loop body
LE: loop exit
PB: predicated region body
PF: predicated region fallthrough
CT: control target
= control target key end

     0   :  { %s2053_s0 = inlined_call_operand.hbm [shape: f32[8,2,20], index: 0, kind: input, shape index: {}]   ;;  %s2054_s1 = inlined_call_operand.hbm [shape: f32[20,32], index: 1, kind: input, shape index: {}]   ;;  %s2055_s2 = inlined_call_operand.vmem [shape: f32[1,32], index: 2, kind: input, shape index: {}]   ;;  %s2056_s3 = inlined_call_operand.vmem [shape: f32[32,128], index: 3, kind: input, shape index: {}]   ;;  %s2057_s4 = inlined_call_operand.vmem [shape: f32[32,128], index: 4, kind: input, shape index: {}]   ;;  %s2058_s5 = inlined_call_operand.vmem [shape: f32[1,128], index: 5, kind: input, shape index: {}]   ;;  %s2059_s6 = inlined_call_operand.vmem [shape: f32[32,16], index: 6, kind: input, shape index: {}]   ;;  %s2060_s7 = inlined_call_operand.vmem [shape: f32[1,16], index: 7, kind: input, shape index: {}]   ;;  %s2061_s8 = inlined_call_operand.vmem [shape: f32[1,16], index: 8, kind: input, shape index: {}]   ;;  %s2062_s9 = inlined_call_operand.<no memory space> [shape: f32[1,1], index: 9, kind: input, shape index: {}]   ;;  %s2063_s10 = inlined_call_operand.hbm [shape: f32[1,2], index: 10, kind: output, shape index: {}]  }
   0x1   :  { %v15_v0 = vstv %s2062_s9 }
   0x2   :  { %16 = vst [vmem:[#allocation2] sm:$0x1] %v15_v0 }
   0x3   :  { %17 = vsyncpa [#allocation4], 0 }
   0x4   :  { %18 = vsyncpa [#allocation7], 0 }
   0x5   :  { %19 = vsyncpa [#allocation5], 0  ;;  %s1761_s15 = smov [#allocation3]   ;;  %s1689_s19 = scalar_lea.hbm %s2053_s0, 256 }
   0x6   :  { %s25_s16 = sshll.u32 %s1761_s15, 4  ;;  %p1690_p0 = scmp.ne.s32.totalorder %s2053_s0, %s1689_s19  ;;  %s26_s16 = int_to_ptr.vmem [resolvable:$true] %s25_s16 }
   0x7   :  { %p1693_p1 = scmp.lt.u32.totalorder %s1689_s19, %s2053_s0 }
   0x9   :  { %p1695_p2 = pnand %p1693_p1, %p1690_p0 }
   0xb   :  { %1698 = shalt.err (!%p1695_p2)
}
   0xc   :  { %s1699_s9 = scalar_lea.vmem %s26_s16, 256  ;;  %p1704_p4 = scmp.lt.s32.totalorder %s26_s16, %s26_s16 }
   0xd   :  { %p1700_p3 = scmp.ne.s32.totalorder %s26_s16, %s1699_s9  ;;  %p1705_p5 = scmp.lt.s32.totalorder %s1699_s9, %s1699_s9 }
   0xf   :  { %p1706_p6 = por %p1705_p5, %p1704_p4 }
  0x11   :  { %p1707_p7 = pnand %p1706_p6, %p1700_p3 }
  0x13   :  { %1710 = shalt.err (!%p1707_p7)
}
  0x14   :  { %s1762_s24 = smov 32   ;;  %s1763_s25 = smov 2  }
  0x15   :  { %31 = dma.hbm_to_vmem [thread:$0]  %s2053_s0, 256, %s26_s16, [#allocation4], %s1762_s24, %s1762_s24, %s1763_s25  }
  0x16   :  { %s1764_s28 = smov [#allocation6]   ;;  %s1711_s12 = scalar_lea.hbm %s2054_s1, 384 }
  0x17   :  { %s37_s29 = sshll.u32 %s1764_s28, 4  ;;  %p1712_p8 = scmp.ne.s32.totalorder %s2054_s1, %s1711_s12  ;;  %s38_s29 = int_to_ptr.vmem [resolvable:$true] %s37_s29 }
  0x18   :  { %p1715_p9 = scmp.lt.u32.totalorder %s1711_s12, %s2054_s1 }
  0x1a   :  { %p1717_p10 = pnand %p1715_p9, %p1712_p8 }
  0x1c   :  { %1720 = shalt.err (!%p1717_p10)
}
  0x1d   :  { %s1721_s18 = scalar_lea.vmem %s38_s29, 384  ;;  %p1726_p12 = scmp.lt.s32.totalorder %s38_s29, %s38_s29 }
  0x1e   :  { %p1722_p11 = scmp.ne.s32.totalorder %s38_s29, %s1721_s18  ;;  %p1727_p13 = scmp.lt.s32.totalorder %s1721_s18, %s1721_s18 }
  0x20   :  { %p1728_p0 = por %p1727_p13, %p1726_p12 }
  0x22   :  { %p1729_p1 = pnand %p1728_p0, %p1722_p11 }
  0x24   :  { %1732 = shalt.err (!%p1729_p1)
}
  0x25   :  { %s1765_s0 = smov 128   ;;  %s1766_s16 = smov 8  }
  0x26   :  { %43 = dma.hbm_to_vmem [thread:$0]  %s2054_s1, 384, %s38_s29, [#allocation7], %s1765_s0, %s1765_s0, %s1766_s16  }
  0x27   :  { %1755 = dma.done.wait [#allocation4], 256  }
  0x28   :  { %1756 = vsyncadd [#allocation4], 4294967040 }
  0x29   :  { %1757 = dma.done.wait [#allocation7], 384  }
  0x2a   :  { %1758 = vsyncadd [#allocation7], 4294966912  ;;  %v97_v1 = vlaneseq  ;;  %v1767_v2 = vmov 1983009808   ;;  %v74_v6 = vld [vmem:[#allocation6] sm:$0xff]  ;;  %v75_v7 = vld [vmem:[#allocation6 + $0x8] sm:$0xff] }
  0x2b   :  { %v95_v3 = vunpack.c.l.s4 %v1767_v2  ;;  %v76_v8 = vld [vmem:[#allocation6 + $0x10] sm:$0xf]  ;;  %vm131_vm0 = vcmask 1043456   ;;  %v1544_v10 = vpack.c.bf16 %v75_v7, %v74_v6  ;;  %v68_v13 = vld [vmem:[#allocation3 + $0x4] sm:$0x3]  ;;  %v213_v25 = vld [vmem:[%s2056_s3 + $0x8] sm:$0xff] }
  0x2c   :  { %v1859_v5 = vshrl.u32 %v97_v1, 7  ;;  %v66_v11 = vld [vmem:[#allocation3] sm:$0x3]  ;;  %v67_v12 = vld [vmem:[#allocation3 + $0x2] sm:$0x3]  ;;  %vm126_vm1 = vcmask 162816  }
  0x2d   :  { %v96_v4 = vunpack.c.0.s8 %v95_v3  ;;  %v69_v14 = vld [vmem:[#allocation3 + $0x6] sm:$0x3]  ;;  %v92_v15 = vcombine.low %v66_v11, %v67_v12  ;;  %v70_v16 = vld [vmem:[#allocation3 + $0x8] sm:$0x3]  ;;  %v71_v17 = vld [vmem:[#allocation3 + $0xa] sm:$0x3]  ;;  %1545 = vmatprep.subr.bf16.mxu0 %v1544_v10 }
  0x2e   :  { %v93_v18 = vcombine.low %v68_v13, %v69_v14  ;;  %v72_v19 = vld [vmem:[#allocation3 + $0xc] sm:$0x3]  ;;  %v73_v20 = vld [vmem:[#allocation3 + $0xe] sm:$0x3]  ;;  %v109_v21 = vcombine.low %v70_v16, %v71_v17  ;;  %v212_v22 = vld [vmem:[%s2056_s3] sm:$0xff]  ;;  %1547 = vmatpush3.bf16.msra.mxu0 %v1544_v10  ;;  %v1768_v38 = vmov 0.0|0.0  }
  0x2f   :  { %v1862_v9 = vsub.s32 %v96_v4, %v1859_v5  ;;  %v110_v24 = vcombine.low %v72_v19, %v73_v20  ;;  %1429 = vmatprep.subr.msk.mxu0 %vm131_vm0, %v76_v8  ;;  %v1548_v28 = vpack.c.bf16 %v213_v25, %v212_v22  ;;  %v214_v32 = vld [vmem:[%s2056_s3 + $0x10] sm:$0xff]  ;;  %v215_v33 = vld [vmem:[%s2056_s3 + $0x18] sm:$0xff]  ;;  %v349_v35 = vld [vmem:[%s2057_s4] sm:$0xff]  ;;  %vm1769_vm2 = vmmov 0   ;;  %s1771_s18 = smov 64  }
  0x30   :  { %v1552_v34 = vpack.c.bf16 %v215_v33, %v214_v32  ;;  %v350_v36 = vld [vmem:[%s2057_s4 + $0x8] sm:$0xff]  ;;  %v351_v39 = vld [vmem:[%s2057_s4 + $0x10] sm:$0xff]  ;;  %v352_v40 = vld [vmem:[%s2057_s4 + $0x18] sm:$0xff]  ;;  %v1770_v42 = vmov 0.0   ;;  %vm223_vm3 = vcmask 261120   ;;  %vm1302_vm4 = vcmask 123904  }
  0x31   :  { %v100_v23 = vrot.slane %v92_v15, %v1862_v9  ;;  %v107_v26 = vrot.slane %v93_v18, %v1862_v9  ;;  %v117_v27 = vrot.slane %v109_v21, %v1862_v9  ;;  %v124_v29 = vrot.slane %v110_v24, %v1862_v9  ;;  %1549 = vmatprep.subr.bf16.mxu1 %v1548_v28  ;;  %v1343_v43 = vld [vmem:[%s2055_s2] ss:$0 sm:$0xff] }
  0x32   :  { %1430 = vmatpush3.msk.msra.mxu0 %vm131_vm0, %v76_v8  ;;  %1551 = vmatpush3.bf16.msra.mxu1 %v1548_v28  ;;  %v1888_v37 = vpack.c.bf16 %v350_v36, %v349_v35  ;;  %v1900_v41 = vpack.c.bf16 %v352_v40, %v351_v39  ;;  %v1347_v52 = vld [vmem:[%s2058_s5] ss:$0 sm:$0xff]  ;;  %vm1325_vm5 = vcmask 8192  }
  0x33   :  { %v108_v30 = vcombine.low %v100_v23, %v107_v26  ;;  %v125_v31 = vcombine.low %v117_v27, %v124_v29  ;;  %1553 = vmatprep.subr.bf16.mxu1 %v1552_v34  ;;  %1556 = vmatprep.subr.bf16.mxu0 %v1768_v38 }
  0x35   :  { %1431 = vmatprep.mubr.msk.f32.mxu0 %vm126_vm1, %v108_v30 }
  0x36   :  { %1432 = vmatmul.mubr.msk.f32.vlgmr.msra.gmra.mrb[0].mxu0 %vm126_vm1, %v125_v31  ;;  %1555 = vmatpush3.bf16.msra.mxu1 %v1552_v34 }
  0x37   :  { %1558 = vmatpush3.bf16.msra.mxu0 %v1888_v37  ;;  %1562 = vmatprep.subr.bf16.mxu1 %v1768_v38 }
  0x38   :  { %1559 = vmatprep.subr.bf16.mxu0 %v1768_v38  ;;  %1453 = vmatprep.mubr.msk.f32.mxu0 %vm1769_vm2, %v1770_v42 }
  0x3b   :  { %1561 = vmatpush3.bf16.msra.mxu0 %v1900_v41 }
  0x3c   :  { %1568 = vmatprep.subr.bf16.mxu0 %v1768_v38 }
  0x3e   :  { %1454 = vmatmul.mubr.f32.vlgmr.msra.gmra.mrb[2].mxu0 %v1770_v42 }
  0x3f   :  { %1570 = vmatpush3.bf16.msra.mxu0 %v1888_v37  ;;  %1475 = vmatprep.mubr.msk.f32.mxu0 %vm1769_vm2, %v1770_v42 }
  0x40   :  { %1571 = vmatprep.subr.bf16.mxu0 %v1768_v38 }
  0x43   :  { %1573 = vmatpush3.bf16.msra.mxu0 %v1900_v41 }
  0x44   :  { %1580 = vmatprep.subr.bf16.mxu0 %v1768_v38 }
 0x109   :  { %v1433_v44 = vpop.f32.mrb[0].mxu0 }
 0x10a   :  { %v207_v45 = vadd.f32 %v1433_v44, %v1343_v43  ;;  %v201_v46 = vpop.f32.mrb[1].mxu0 }
 0x10b   :  { %v202_v47 = vadd.f32 %v1343_v43, %v201_v46 }
 0x10c   :  { %v211_v49 = vmax.f32 %v207_v45, 0.0 }
 0x10d   :  { %v210_v48 = vmax.f32 %v202_v47, 0.0 }
 0x10f   :  { %1442 = vmatprep.mubr.msk.f32.mxu1 %vm223_vm3, %v210_v48 }
 0x110   :  { %1443 = vmatmul.mubr.msk.f32.vlgmr.msra.gmra.mrb[0].mxu1 %vm223_vm3, %v211_v49 }
 0x111   :  { %1564 = vmatpush3.bf16.msra.mxu1 %v1888_v37  ;;  %1464 = vmatprep.mubr.msk.f32.mxu1 %vm1769_vm2, %v1770_v42  ;;  %v422_v50 = vpop.f32.mrb[2].mxu0 }
 0x112   :  { %1565 = vmatprep.subr.bf16.mxu1 %v1768_v38  ;;  %v1455_v51 = vpop.f32.mrb[3].mxu0 }
 0x115   :  { %1567 = vmatpush3.bf16.msra.mxu1 %v1900_v41 }
 0x116   :  { %1574 = vmatprep.subr.bf16.mxu1 %v1768_v38 }
 0x1e3   :  { %v1444_v53 = vpop.f32.mrb[0].mxu1 }
 0x1e4   :  { %v1927_v54 = vadd.f32 %v1444_v53, %v1347_v52  ;;  %v296_v55 = vpop.f32.mrb[1].mxu1 }
 0x1e5   :  { %v1929_v56 = vadd.f32 %v1347_v52, %v296_v55 }
 0x1e7   :  { %v314_v57 = vrot.slane %v1929_v56, %v1862_v9  ;;  %v307_v32 = vcombine.high %v1929_v56, %v1929_v56 }
 0x1e9   :  { %v426_v58 = vadd.f32 %v422_v50, %v314_v57  ;;  %v322_v13 = vcombine.high %v314_v57, %v314_v57  ;;  %v321_v33 = vrot.slane %v307_v32, %v1862_v9 }
 0x1eb   :  { %1625 = vtanh.f32 %v426_v58  ;;  %v1350_v60 = vmul.f32 -1.442695, %v426_v58  ;;  %v323_v57 = vcombine.high %v321_v33, %v321_v33 }
 0x1ed   :  { %1627 = vpow2.f32 %v1350_v60 }
 0x1f5   :  { %v1626_v59 = vpop.eup %1625 }
 0x1f6   :  { %436 = vrot.lane.b32.xlu0 %v1626_v59, %s1771_s18 }
 0x1f7   :  { %v1628_v61 = vpop.eup %1627 }
 0x1f8   :  { %v430_v62 = vadd.f32 1.0, %v1628_v61 }
 0x1fa   :  { %1629 = vrcp.f32 %v430_v62 }
 0x204   :  { %v1630_v63 = vpop.eup %1629 }
 0x205   :  { %v434_v3 = vmul.f32 0.0, %v1630_v63 }
 0x268   :  { %v437_v0 = vpop.permute.xlu0 %436 }
 0x269   :  { %v439_v2 = vmul.f32 %v1630_v63, %v437_v0 }
 0x26b   :  { %441 = vrot.lane.b32.xlu0 %v439_v2, %s1762_s24 }
 0x2dd   :  { %v442_v4 = vpop.permute.xlu0 %441 }
 0x2de   :  { %v444_v6 = vadd.f32 %v442_v4, %v434_v3 }
 0x2e0   :  { %1631 = vtanh.f32 %v444_v6 }
 0x2ea   :  { %v1632_v7 = vpop.eup %1631 }
 0x2eb   :  { %447 = vrot.lane.b32.xlu1 %v1632_v7, %s1771_s18 }
 0x35d   :  { %v448_v8 = vpop.permute.xlu1 %447 }
 0x35e   :  { %v450_v10 = vmul.f32 %v1630_v63, %v448_v8 }
 0x360   :  { %v458_v11 = vrot.slane %v450_v10, %v1862_v9 }
 0x362   :  { %459 = vrot.lane.b32.xlu1 %v458_v11, %s1762_s24 }
 0x3d4   :  { %v460_v12 = vpop.permute.xlu1 %459 }
 0x3d5   :  { %1465 = vmatmul.mubr.msk.f32.vlgmr.msra.gmra.mrb[2].mxu1 %vm223_vm3, %v460_v12 }
 0x3d6   :  { %1576 = vmatpush3.bf16.msra.mxu1 %v1888_v37  ;;  %1486 = vmatprep.mubr.msk.f32.mxu1 %vm1769_vm2, %v1770_v42 }
 0x3d7   :  { %1577 = vmatprep.subr.bf16.mxu1 %v1768_v38 }
 0x3da   :  { %1579 = vmatpush3.bf16.msra.mxu1 %v1900_v41 }
 0x3db   :  { %1586 = vmatprep.subr.bf16.mxu1 %v1768_v38 }
 0x4a8   :  { %v529_v14 = vpop.f32.mrb[2].mxu1 }
 0x4a9   :  { %v533_v15 = vadd.f32 %v529_v14, %v322_v13  ;;  %v1466_v16 = vpop.f32.mrb[3].mxu1 }
 0x4ab   :  { %1633 = vtanh.f32 %v533_v15  ;;  %v1352_v18 = vmul.f32 -1.442695, %v533_v15  ;;  %v331_v15 = vrot.slane %v1927_v54, %v1862_v9 }
 0x4ad   :  { %1635 = vpow2.f32 %v1352_v18 }
 0x4b5   :  { %v1634_v17 = vpop.eup %1633 }
 0x4b6   :  { %543 = vrot.lane.b32.xlu0 %v1634_v17, %s1771_s18 }
 0x4b7   :  { %v1636_v19 = vpop.eup %1635 }
 0x4b8   :  { %v537_v20 = vadd.f32 1.0, %v1636_v19 }
 0x4ba   :  { %1637 = vrcp.f32 %v537_v20 }
 0x4c4   :  { %v1638_v21 = vpop.eup %1637 }
 0x4c5   :  { %v541_v24 = vmul.f32 %v1638_v21, %v444_v6 }
 0x528   :  { %v544_v22 = vpop.permute.xlu0 %543 }
 0x529   :  { %v546_v23 = vmul.f32 %v1638_v21, %v544_v22 }
 0x52b   :  { %548 = vrot.lane.b32.xlu1 %v546_v23, %s1762_s24 }
 0x59d   :  { %v549_v25 = vpop.permute.xlu1 %548 }
 0x59e   :  { %v551_v26 = vadd.f32 %v549_v25, %v541_v24 }
 0x5a0   :  { %1639 = vtanh.f32 %v551_v26 }
 0x5aa   :  { %v1640_v27 = vpop.eup %1639 }
 0x5ab   :  { %554 = vrot.lane.b32.xlu0 %v1640_v27, %s1771_s18 }
 0x61d   :  { %v555_v28 = vpop.permute.xlu0 %554 }
 0x61e   :  { %v557_v29 = vmul.f32 %v1638_v21, %v555_v28 }
 0x620   :  { %v565_v30 = vrot.slane %v557_v29, %v1862_v9 }
 0x622   :  { %566 = vrot.lane.b32.xlu1 %v565_v30, %s1762_s24 }
 0x694   :  { %v567_v31 = vpop.permute.xlu1 %566 }
 0x695   :  { %1476 = vmatmul.mubr.msk.f32.vlgmr.msra.gmra.mrb[4].mxu0 %vm223_vm3, %v567_v31 }
 0x696   :  { %1582 = vmatpush3.bf16.msra.mxu0 %v1888_v37  ;;  %1497 = vmatprep.mubr.msk.f32.mxu0 %vm1769_vm2, %v1770_v42 }
 0x697   :  { %1583 = vmatprep.subr.bf16.mxu0 %v1768_v38 }
 0x69a   :  { %1585 = vmatpush3.bf16.msra.mxu0 %v1900_v41 }
 0x69b   :  { %1592 = vmatprep.subr.bf16.mxu0 %v1768_v38 }
 0x768   :  { %v636_v34 = vpop.f32.mrb[4].mxu0 }
 0x769   :  { %v640_v35 = vadd.f32 %v636_v34, %v321_v33  ;;  %v1477_v36 = vpop.f32.mrb[5].mxu0  ;;  %v339_v34 = vcombine.high %v331_v15, %v331_v15 }
 0x76b   :  { %1641 = vtanh.f32 %v640_v35  ;;  %v1354_v40 = vmul.f32 -1.442695, %v640_v35 }
 0x76d   :  { %1643 = vpow2.f32 %v1354_v40 }
 0x775   :  { %v1642_v39 = vpop.eup %1641 }
 0x776   :  { %650 = vrot.lane.b32.xlu0 %v1642_v39, %s1771_s18 }
 0x777   :  { %v1644_v43 = vpop.eup %1643 }
 0x778   :  { %v644_v44 = vadd.f32 1.0, %v1644_v43 }
 0x77a   :  { %1645 = vrcp.f32 %v644_v44 }
 0x784   :  { %v1646_v45 = vpop.eup %1645 }
 0x785   :  { %v648_v48 = vmul.f32 %v1646_v45, %v551_v26 }
 0x7e8   :  { %v651_v46 = vpop.permute.xlu0 %650 }
 0x7e9   :  { %v653_v47 = vmul.f32 %v1646_v45, %v651_v46 }
 0x7eb   :  { %655 = vrot.lane.b32.xlu1 %v653_v47, %s1762_s24 }
 0x85d   :  { %v656_v49 = vpop.permute.xlu1 %655 }
 0x85e   :  { %v658_v50 = vadd.f32 %v656_v49, %v648_v48 }
 0x860   :  { %1647 = vtanh.f32 %v658_v50 }
 0x86a   :  { %v1648_v51 = vpop.eup %1647 }
 0x86b   :  { %661 = vrot.lane.b32.xlu0 %v1648_v51, %s1771_s18 }
 0x8dd   :  { %v662_v52 = vpop.permute.xlu0 %661 }
 0x8de   :  { %v664_v53 = vmul.f32 %v1646_v45, %v662_v52 }
 0x8e0   :  { %v672_v55 = vrot.slane %v664_v53, %v1862_v9 }
 0x8e2   :  { %673 = vrot.lane.b32.xlu1 %v672_v55, %s1762_s24 }
 0x954   :  { %v674_v56 = vpop.permute.xlu1 %673 }
 0x955   :  { %1487 = vmatmul.mubr.msk.f32.vlgmr.msra.gmra.mrb[4].mxu1 %vm223_vm3, %v674_v56  ;;  %v324_v56 = vcombine.high %v1927_v54, %v1927_v54 }
 0x956   :  { %1588 = vmatpush3.bf16.msra.mxu1 %v1888_v37  ;;  %1508 = vmatprep.mubr.msk.f32.mxu1 %vm1769_vm2, %v1770_v42 }
 0x957   :  { %1589 = vmatprep.subr.bf16.mxu1 %v1768_v38 }
 0x95a   :  { %1591 = vmatpush3.bf16.msra.mxu1 %v1900_v41 }
 0x95b   :  { %1598 = vmatprep.subr.bf16.mxu1 %v1768_v38 }
 0xa28   :  { %v743_v58 = vpop.f32.mrb[4].mxu1 }
 0xa29   :  { %v747_v59 = vadd.f32 %v743_v58, %v323_v57  ;;  %v1488_v60 = vpop.f32.mrb[5].mxu1  ;;  %v338_v57 = vrot.slane %v324_v56, %v1862_v9 }
 0xa2b   :  { %1649 = vtanh.f32 %v747_v59  ;;  %v1356_v62 = vmul.f32 -1.442695, %v747_v59 }
 0xa2d   :  { %1651 = vpow2.f32 %v1356_v62 }
 0xa35   :  { %v1650_v61 = vpop.eup %1649 }
 0xa36   :  { %757 = vrot.lane.b32.xlu0 %v1650_v61, %s1771_s18 }
 0xa37   :  { %v1652_v63 = vpop.eup %1651 }
 0xa38   :  { %v751_v0 = vadd.f32 1.0, %v1652_v63 }
 0xa3a   :  { %1653 = vrcp.f32 %v751_v0 }
 0xa44   :  { %v1654_v2 = vpop.eup %1653 }
 0xa45   :  { %v755_v6 = vmul.f32 %v1654_v2, %v658_v50 }
 0xaa8   :  { %v758_v3 = vpop.permute.xlu0 %757 }
 0xaa9   :  { %v760_v4 = vmul.f32 %v1654_v2, %v758_v3 }
 0xaab   :  { %762 = vrot.lane.b32.xlu1 %v760_v4, %s1762_s24 }
 0xb1d   :  { %v763_v7 = vpop.permute.xlu1 %762 }
 0xb1e   :  { %v765_v8 = vadd.f32 %v763_v7, %v755_v6 }
 0xb20   :  { %1655 = vtanh.f32 %v765_v8 }
 0xb2a   :  { %v1656_v10 = vpop.eup %1655 }
 0xb2b   :  { %768 = vrot.lane.b32.xlu0 %v1656_v10, %s1771_s18 }
 0xb9d   :  { %v769_v11 = vpop.permute.xlu0 %768 }
 0xb9e   :  { %v771_v12 = vmul.f32 %v1654_v2, %v769_v11 }
 0xba0   :  { %v779_v13 = vrot.slane %v771_v12, %v1862_v9 }
 0xba2   :  { %780 = vrot.lane.b32.xlu1 %v779_v13, %s1762_s24  ;;  %v340_v13 = vcombine.high %v338_v57, %v338_v57 }
 0xc14   :  { %v781_v14 = vpop.permute.xlu1 %780 }
 0xc15   :  { %1498 = vmatmul.mubr.msk.f32.vlgmr.msra.gmra.mrb[6].mxu0 %vm223_vm3, %v781_v14 }
 0xc16   :  { %1594 = vmatpush3.bf16.msra.mxu0 %v1888_v37  ;;  %1519 = vmatprep.mubr.msk.f32.mxu0 %vm1769_vm2, %v1770_v42 }
 0xc17   :  { %1595 = vmatprep.subr.bf16.mxu0 %v1768_v38 }
 0xc1a   :  { %1597 = vmatpush3.bf16.msra.mxu0 %v1900_v41 }
 0xc1b   :  { %1604 = vmatprep.subr.bf16.mxu0 %v1768_v38 }
 0xce8   :  { %v850_v16 = vpop.f32.mrb[6].mxu0 }
 0xce9   :  { %v854_v17 = vadd.f32 %v850_v16, %v331_v15  ;;  %v1499_v18 = vpop.f32.mrb[7].mxu0 }
 0xceb   :  { %1657 = vtanh.f32 %v854_v17  ;;  %v1358_v20 = vmul.f32 -1.442695, %v854_v17 }
 0xced   :  { %1659 = vpow2.f32 %v1358_v20 }
 0xcf5   :  { %v1658_v19 = vpop.eup %1657 }
 0xcf6   :  { %864 = vrot.lane.b32.xlu0 %v1658_v19, %s1771_s18 }
 0xcf7   :  { %v1660_v21 = vpop.eup %1659 }
 0xcf8   :  { %v858_v22 = vadd.f32 1.0, %v1660_v21 }
 0xcfa   :  { %1661 = vrcp.f32 %v858_v22 }
 0xd04   :  { %v1662_v23 = vpop.eup %1661 }
 0xd05   :  { %v862_v26 = vmul.f32 %v1662_v23, %v765_v8 }
 0xd68   :  { %v865_v24 = vpop.permute.xlu0 %864 }
 0xd69   :  { %v867_v25 = vmul.f32 %v1662_v23, %v865_v24 }
 0xd6b   :  { %869 = vrot.lane.b32.xlu1 %v867_v25, %s1762_s24 }
 0xddd   :  { %v870_v27 = vpop.permute.xlu1 %869 }
 0xdde   :  { %v872_v28 = vadd.f32 %v870_v27, %v862_v26  ;;  %v1200_v27 = vld [vmem:[%s2059_s6] sm:$0xff] }
 0xde0   :  { %1663 = vtanh.f32 %v872_v28 }
 0xdea   :  { %v1664_v29 = vpop.eup %1663 }
 0xdeb   :  { %875 = vrot.lane.b32.xlu0 %v1664_v29, %s1771_s18  ;;  %v1202_v29 = vld [vmem:[%s2059_s6 + $0x10] sm:$0xff] }
 0xe5d   :  { %v876_v30 = vpop.permute.xlu0 %875 }
 0xe5e   :  { %v878_v31 = vmul.f32 %v1662_v23, %v876_v30 }
 0xe60   :  { %v886_v32 = vrot.slane %v878_v31, %v1862_v9  ;;  %v1203_v31 = vld [vmem:[%s2059_s6 + $0x18] sm:$0xff] }
 0xe62   :  { %887 = vrot.lane.b32.xlu1 %v886_v32, %s1762_s24  ;;  %v1608_v32 = vpack.c.bf16 %v1203_v31, %v1202_v29 }
 0xed4   :  { %v888_v33 = vpop.permute.xlu1 %887 }
 0xed5   :  { %1509 = vmatmul.mubr.msk.f32.vlgmr.msra.gmra.mrb[6].mxu1 %vm223_vm3, %v888_v33 }
 0xed6   :  { %1600 = vmatpush3.bf16.msra.mxu1 %v1888_v37  ;;  %1530 = vmatprep.mubr.msk.f32.mxu1 %vm1769_vm2, %v1770_v42 }
 0xed7   :  { %1601 = vmatprep.subr.bf16.mxu1 %v1768_v38 }
 0xeda   :  { %1603 = vmatpush3.bf16.msra.mxu1 %v1900_v41 }
 0xfa8   :  { %v957_v35 = vpop.f32.mrb[6].mxu1 }
 0xfa9   :  { %v961_v36 = vadd.f32 %v957_v35, %v339_v34  ;;  %v1510_v39 = vpop.f32.mrb[7].mxu1 }
 0xfab   :  { %1665 = vtanh.f32 %v961_v36  ;;  %v1360_v43 = vmul.f32 -1.442695, %v961_v36 }
 0xfad   :  { %1667 = vpow2.f32 %v1360_v43 }
 0xfb5   :  { %v1666_v40 = vpop.eup %1665 }
 0xfb6   :  { %971 = vrot.lane.b32.xlu0 %v1666_v40, %s1771_s18  ;;  %v1365_v40 = vld [vmem:[%s2060_s7] ss:$0 sm:$0xff]  ;;  %s1773_s7 = smov [#allocation8]  }
 0xfb7   :  { %v1668_v44 = vpop.eup %1667 }
 0xfb8   :  { %v965_v45 = vadd.f32 1.0, %v1668_v44 }
 0xfba   :  { %1669 = vrcp.f32 %v965_v45  ;;  %v1367_v45 = vld [vmem:[%s2061_s8] ss:$0 sm:$0xff] }
 0xfc4   :  { %v1670_v37 = vpop.eup %1669 }
 0xfc5   :  { %v969_v48 = vmul.f32 %v1670_v37, %v872_v28  ;;  %v1201_v28 = vld [vmem:[%s2059_s6 + $0x8] sm:$0xff] }
 0xfc6   :  { %v1605_v30 = vpack.c.bf16 %v1201_v28, %v1200_v27 }
0x1028   :  { %v972_v46 = vpop.permute.xlu0 %971 }
0x1029   :  { %v974_v47 = vmul.f32 %v1670_v37, %v972_v46 }
0x102b   :  { %976 = vrot.lane.b32.xlu1 %v974_v47, %s1762_s24  ;;  %v1772_v47 = vmov 0  }
0x102c   :  { %1623 = vset.pattern.permute.xlu1 %v1772_v47  ;;  %1624 = vset.pattern.permute.xlu0 %v1772_v47 }
0x109d   :  { %v977_v41 = vpop.permute.xlu1 %976 }
0x109e   :  { %v979_v49 = vadd.f32 %v977_v41, %v969_v48  ;;  %v1368_v48 = vld [vmem:[#allocation2] ss:$0 sm:$0xff] }
0x10a0   :  { %1671 = vtanh.f32 %v979_v49 }
0x10aa   :  { %v1672_v50 = vpop.eup %1671 }
0x10ab   :  { %982 = vrot.lane.b32.xlu0 %v1672_v50, %s1771_s18  ;;  %v1319_v50 = vand.u32 127, %v97_v1 }
0x111d   :  { %v983_v51 = vpop.permute.xlu0 %982 }
0x111e   :  { %v985_v52 = vmul.f32 %v1670_v37, %v983_v51  ;;  %v1322_v51 = vsub.s32 %v1319_v50, %v1859_v5 }
0x1120   :  { %v993_v53 = vrot.slane %v985_v52, %v1862_v9 }
0x1122   :  { %994 = vrot.lane.b32.xlu1 %v993_v53, %s1762_s24 }
0x1194   :  { %v995_v55 = vpop.permute.xlu1 %994 }
0x1195   :  { %1520 = vmatmul.mubr.msk.f32.vlgmr.msra.gmra.mrb[8].mxu0 %vm223_vm3, %v995_v55 }
0x1196   :  { %1541 = vmatprep.mubr.msk.f32.mxu0 %vm1769_vm2, %v1770_v42  ;;  %1606 = vmatpush3.bf16.msra.mxu0 %v1605_v30 }
0x1197   :  { %1607 = vmatprep.subr.bf16.mxu0 %v1768_v38 }
0x119a   :  { %1609 = vmatpush3.bf16.msra.mxu0 %v1608_v32 }
0x1268   :  { %v1064_v58 = vpop.f32.mrb[8].mxu0 }
0x1269   :  { %v1068_v59 = vadd.f32 %v1064_v58, %v338_v57  ;;  %v1521_v60 = vpop.f32.mrb[9].mxu0 }
0x126b   :  { %1673 = vtanh.f32 %v1068_v59  ;;  %v1362_v62 = vmul.f32 -1.442695, %v1068_v59 }
0x126d   :  { %1675 = vpow2.f32 %v1362_v62 }
0x1275   :  { %v1674_v61 = vpop.eup %1673 }
0x1276   :  { %1078 = vrot.lane.b32.xlu0 %v1674_v61, %s1771_s18 }
0x1277   :  { %v1676_v63 = vpop.eup %1675 }
0x1278   :  { %v1072_v0 = vadd.f32 1.0, %v1676_v63 }
0x127a   :  { %1677 = vrcp.f32 %v1072_v0 }
0x1284   :  { %v1678_v2 = vpop.eup %1677 }
0x1285   :  { %v1076_v54 = vmul.f32 %v1678_v2, %v979_v49 }
0x12e8   :  { %v1079_v3 = vpop.permute.xlu0 %1078 }
0x12e9   :  { %v1081_v42 = vmul.f32 %v1678_v2, %v1079_v3 }
0x12eb   :  { %1083 = vrot.lane.b32.xlu1 %v1081_v42, %s1762_s24 }
0x135d   :  { %v1084_v4 = vpop.permute.xlu1 %1083 }
0x135e   :  { %v1086_v6 = vadd.f32 %v1084_v4, %v1076_v54 }
0x1360   :  { %1679 = vtanh.f32 %v1086_v6 }
0x136a   :  { %v1680_v7 = vpop.eup %1679 }
0x136b   :  { %1089 = vrot.lane.b32.xlu0 %v1680_v7, %s1771_s18 }
0x13dd   :  { %v1090_v8 = vpop.permute.xlu0 %1089 }
0x13de   :  { %v1092_v10 = vmul.f32 %v1678_v2, %v1090_v8 }
0x13e0   :  { %v1100_v11 = vrot.slane %v1092_v10, %v1862_v9 }
0x13e2   :  { %1101 = vrot.lane.b32.xlu1 %v1100_v11, %s1762_s24 }
0x1454   :  { %v1102_v12 = vpop.permute.xlu1 %1101 }
0x1455   :  { %1531 = vmatmul.mubr.msk.f32.vlgmr.msra.gmra.mrb[8].mxu1 %vm223_vm3, %v1102_v12 }
0x1528   :  { %v1171_v14 = vpop.f32.mrb[8].mxu1 }
0x1529   :  { %v1175_v15 = vadd.f32 %v1171_v14, %v340_v13  ;;  %v1532_v16 = vpop.f32.mrb[9].mxu1 }
0x152b   :  { %1681 = vtanh.f32 %v1175_v15  ;;  %v1364_v18 = vmul.f32 -1.442695, %v1175_v15 }
0x152d   :  { %1683 = vpow2.f32 %v1364_v18 }
0x1535   :  { %v1682_v17 = vpop.eup %1681 }
0x1536   :  { %1185 = vrot.lane.b32.xlu0 %v1682_v17, %s1771_s18 }
0x1537   :  { %v1684_v19 = vpop.eup %1683 }
0x1538   :  { %v1179_v20 = vadd.f32 1.0, %v1684_v19 }
0x153a   :  { %1685 = vrcp.f32 %v1179_v20 }
0x1544   :  { %v1686_v21 = vpop.eup %1685 }
0x1545   :  { %v1183_v24 = vmul.f32 %v1686_v21, %v1086_v6 }
0x15a8   :  { %v1186_v22 = vpop.permute.xlu0 %1185 }
0x15a9   :  { %v1188_v23 = vmul.f32 %v1686_v21, %v1186_v22 }
0x15ab   :  { %1190 = vrot.lane.b32.xlu1 %v1188_v23, %s1762_s24 }
0x161d   :  { %v1191_v25 = vpop.permute.xlu1 %1190 }
0x161e   :  { %v1193_v26 = vadd.f32 %v1191_v25, %v1183_v24 }
0x1620   :  { %1687 = vtanh.f32 %v1193_v26 }
0x162a   :  { %v1688_v33 = vpop.eup %1687 }
0x162b   :  { %1196 = vrot.lane.b32.xlu0 %v1688_v33, %s1771_s18 }
0x169d   :  { %v1197_v34 = vpop.permute.xlu0 %1196 }
0x169e   :  { %v1199_v35 = vmul.f32 %v1686_v21, %v1197_v34 }
0x16a0   :  { %v1218_v36 = vrot.slane %v1199_v35, %v1862_v9 }
0x16a2   :  { %1219 = vrot.lane.b32.xlu1 %v1218_v36, %s1762_s24  ;;  %s1333_s24 = sshll.u32 %s1773_s7, 4  ;;  %s1334_s24 = int_to_ptr.vmem [resolvable:$true] %s1333_s24 }
0x16a3   :  { %s1733_s8 = scalar_lea.vmem %s1334_s24, 16  ;;  %s1737_s26 = scalar_lea.vmem %s1334_s24, 32 }
0x16a4   :  { %p1734_p2 = scmp.ne.s32.totalorder %s1334_s24, %s1733_s8  ;;  %p1738_p3 = scmp.lt.s32.totalorder %s1334_s24, %s1334_s24 }
0x16a5   :  { %p1739_p4 = scmp.lt.s32.totalorder %s1737_s26, %s1733_s8 }
0x16a7   :  { %p1740_p5 = por %p1739_p4, %p1738_p3 }
0x16a9   :  { %p1741_p6 = pnand %p1740_p5, %p1734_p2 }
0x1714   :  { %v1220_v39 = vpop.permute.xlu1 %1219 }
0x1715   :  { %1542 = vmatmul.mubr.msk.f32.vlgmr.msra.gmra.mrb[10].mxu0 %vm223_vm3, %v1220_v39 }
0x17e8   :  { %v1289_v43 = vpop.f32.mrb[10].mxu0 }
0x17e9   :  { %v1290_v44 = vadd.f32 %v1365_v40, %v1289_v43  ;;  %v1543_v38 = vpop.f32.mrb[11].mxu0 }
0x17eb   :  { %v1293_v37 = vmax.f32 %v1290_v44, 0.0 }
0x17ed   :  { %v1301_v46 = vmul.f32 %v1367_v45, %v1293_v37 }
0x17ef   :  { %v1303_v9 = vsel %vm1302_vm4, %v1301_v46, 0.0 }
0x17f0   :  { %1304 = vadd.xlane.f32.xlu0 %v1303_v9 }
0x187d   :  { %v1305_v41 = vpop.xlane.xlu0 %1304 }
0x187e   :  { %v1313_v49 = vadd.f32 %v1368_v48, %v1305_v41 }
0x1880   :  { %1316 = vperm.xlu1 %1623, %v1313_v49  }
0x18ff   :  { %v1317_v52 = vpop.permute.xlu1 %1316 }
0x1900   :  { %v1323_v53 = vrot.slane %v1317_v52, %v1322_v51 }
0x1902   :  { %1326 = vst.msk [vmem:[#allocation8] sm:$0x1] %vm1325_vm5, %v1323_v53 }
0x1903   :  { %1744 = shalt.err (!%p1741_p6)
}
0x1904   :  { %s1745_s29 = scalar_lea.hbm %s2063_s10, 16 }
0x1905   :  { %p1746_p7 = scmp.ne.s32.totalorder %s2063_s10, %s1745_s29  ;;  %p1749_p8 = scmp.lt.u32.totalorder %s1745_s29, %s2063_s10 }
0x1907   :  { %p1751_p9 = pnand %p1749_p8, %p1746_p7 }
0x1909   :  { %1754 = shalt.err (!%p1751_p9)
}
0x190a   :  { %1336 = dma.vmem_to_hbm [thread:$0]  %s1334_s24, 16, %s2063_s10, [#allocation5]  }
0x190b   :  { %1759 = dma.done.wait [#allocation5], 16  }
0x190c   :  { %1760 = vsyncadd [#allocation5], 4294967280 }
0x190d   :  { %1340 = vsyncpa [#allocation4], 1 }
0x190e   :  { %1341 = vsyncpa [#allocation7], 1 }
0x190f   :  { %1342 = vsyncpa [#allocation5], 1 }

</bundles_post_ra>
